<compile_context>
chip_gen: v6e
topology: v6e:2x2x1
jax: 0.10.0
libtpu: 0.0.40
codegen_flags: <defaults>
</compile_context>

<pallas_src>
import jax
import jax.numpy as jnp
from jax.experimental import pallas as pl
from jax.experimental.pallas import tpu as pltpu

LANE = 128            # lane (fast) axis width
SUB_ROWS = 64         # rows per inner-loop step (8 f32 vregs per operand slice)
MAX_TILE_ROWS = 2048  # 2048*128*4 B = 1 MiB per f32 input block (x2 buffers x3 inputs = 6 MiB)
EPS = 0.0001          # matches the PyTorch 0.0001 constant


def _round_up(x, m):
    return ((x + m - 1) // m) * m


def _wbce_ske_kernel(n_ref, params_ref, logits_ref, labels_ref, skes_ref, out_ref):
    c = pl.program_id(0)
    j = pl.program_id(1)
    steps = pl.num_programs(1)

    @pl.when(j == 0)
    def _():
        out_ref[...] = jnp.zeros_like(out_ref)

    n_valid = n_ref[0]                   # number of real (unpadded) elements
    cw_pos = params_ref[0, 0]            # classweights[0][0]
    cw_neg = params_ref[0, 1]            # classweights[0][1]
    ske_w_m1 = params_ref[0, 2] - 1.0    # ske_weight - gt_weight (gt_weight = 1.0)

    tile_rows = logits_ref.shape[0]
    # Flat element index of the first element of this *logical* tile (not clamped,
    # so a duplicated / OOB boundary tile is fully masked out below).
    tile_base = (c * steps + j) * (tile_rows * LANE)

    # Per-slice element offsets; constant across the inner loop (hoisted).
    sub_idx = (
        jax.lax.broadcasted_iota(jnp.int32, (SUB_ROWS, LANE), 0) * LANE
        + jax.lax.broadcasted_iota(jnp.int32, (SUB_ROWS, LANE), 1)
    )

    def body(s, accs):
        acc0, acc1 = accs
        r0 = pl.multiple_of(s * SUB_ROWS, SUB_ROWS)
        x = logits_ref[pl.ds(r0, SUB_ROWS), :]   # (SUB_ROWS, 128) f32 logits
        y = labels_ref[pl.ds(r0, SUB_ROWS), :]   # (SUB_ROWS, 128) f32 {0,1} mask
        sk = skes_ref[pl.ds(r0, SUB_ROWS), :]    # (SUB_ROWS, 128) f32 {0,1} mask

        # Ragged-tail / OOB mask: drop anything whose flat index is >= n.
        valid = (sub_idx + (tile_base + r0 * LANE)) < n_valid

        pos = y == 1.0
        neg = y == 0.0
        pos_ske = sk == 1.0
        neg_ske = sk == 0.0

        p = jax.nn.sigmoid(x)
        log1mp = jnp.log(1.0 - p + EPS)

        # Negative side: cw_neg * ([neg] + [neg_ske]*(1-y)) * log(1-p+eps) — one log.
        neg_w = jnp.where(neg, 1.0, 0.0) + jnp.where(neg_ske, 1.0 - y, 0.0)

        # Positive side: [pos]*log(p+eps) + [pos_ske]*y*log(p*(skew-1)+eps), merged
        # into one log (labels are a 0/1 mask, so y acts as the pos gate).
        arg_pos = jnp.where(pos, p + EPS, 1.0) * jnp.where(
            pos & pos_ske, p * ske_w_m1 + EPS, 1.0
        )

        contrib = (cw_neg * neg_w) * log1mp + cw_pos * jnp.log(arg_pos)
        contrib = jnp.where(valid, contrib, 0.0)

        # Reduce (SUB_ROWS,128) -> (8,128) with leading-axis VPU adds; split across
        # two accumulators to break the add dependency chain.
        red = contrib.reshape(SUB_ROWS // 8, 8, LANE)
        half = SUB_ROWS // 16
        acc0 = acc0 + red[:half].sum(axis=0)
        acc1 = acc1 + red[half:].sum(axis=0)
        return acc0, acc1

    n_sub = tile_rows // SUB_ROWS
    zero = jnp.zeros((8, LANE), jnp.float32)
    acc0, acc1 = jax.lax.fori_loop(
        0, n_sub, body, (zero, zero), unroll=(2 if n_sub >= 2 else 1)
    )
    out_ref[...] += acc0 + acc1


def weighted_bce_loss2d_ske(logits, labels, skes, classweights, ske_weight):
    # Flatten (torch .view(-1)).  No dtype casts and no tile-granularity pads:
    # masks are consumed in native f32 and the tail is masked in-kernel.
    flat_logits = logits.reshape(-1)
    flat_labels = labels.reshape(-1)
    flat_skes = skes.reshape(-1)
    if flat_logits.dtype != jnp.float32:
        flat_logits = flat_logits.astype(jnp.float32)
    if flat_labels.dtype != jnp.float32:
        flat_labels = flat_labels.astype(jnp.float32)
    if flat_skes.dtype != jnp.float32:
        flat_skes = flat_skes.astype(jnp.float32)

    n = flat_logits.shape[0]

    # Lane alignment only: pad by < 128 elements iff n % 128 != 0 (rare for
    # image tensors; zero-pad is fine because the in-kernel index mask drops it).
    if n % LANE:
        pad = LANE - (n % LANE)
        flat_logits = jnp.pad(flat_logits, (0, pad))
        flat_labels = jnp.pad(flat_labels, (0, pad))
        flat_skes = jnp.pad(flat_skes, (0, pad))
    rows = flat_logits.shape[0] // LANE

    L = flat_logits.reshape(rows, LANE)
    Y = flat_labels.reshape(rows, LANE)
    S = flat_skes.reshape(rows, LANE)

    tile_rows = min(MAX_TILE_ROWS, _round_up(rows, SUB_ROWS))
    tiles = pl.cdiv(rows, tile_rows)
    n_chunks = 2 if tiles >= 2 else 1          # only split when there is real work
    steps = pl.cdiv(tiles, n_chunks)
    last_tile = tiles - 1

    cw = jnp.asarray(classweights, jnp.float32)
    params = jnp.stack(
        [cw[0, 0], cw[0, 1], jnp.asarray(ske_weight, jnp.float32)]
    ).reshape(1, 3)
    n_arr = jnp.asarray([n], dtype=jnp.int32)

    def data_map(c, j):
        # Clamp so no block starts past the array; any duplicate/overrun work is
        # zeroed by the in-kernel flat-index mask.
        return (jnp.minimum(c * steps + j, last_tile), 0)

    partials = pl.pallas_call(
        _wbce_ske_kernel,
        out_shape=jax.ShapeDtypeStruct((n_chunks * 8, LANE), jnp.float32),
        grid_spec=pltpu.PrefetchScalarGridSpec(
            num_scalar_prefetch=0,
            grid=(n_chunks, steps),
            in_specs=[
                pl.BlockSpec(memory_space=pltpu.MemorySpace.SMEM),   # n (int32[1])
                pl.BlockSpec(memory_space=pltpu.MemorySpace.SMEM),   # params (f32[1,3])
                pl.BlockSpec((tile_rows, LANE), data_map),           # logits
                pl.BlockSpec((tile_rows, LANE), data_map),           # labels
                pl.BlockSpec((tile_rows, LANE), data_map),           # skes
            ],
            out_specs=pl.BlockSpec((8, LANE), lambda c, j: (c, 0)),
        ),
        compiler_params=pltpu.CompilerParams(
            dimension_semantics=("parallel", "arbitrary"),
        ),
    )(n_arr, params, L, Y, S)

    # Tiny cross-lane reduction + negate done in JAX.
    return -jnp.sum(partials)


def _reference(logits, labels, skes, classweights, ske_weight):
    gt_weight = 1.0
    p = jax.nn.sigmoid(logits).reshape(-1)
    y = labels.reshape(-1)
    s = skes.reshape(-1)
    pos = y == 1.0
    neg = y == 0.0
    pos_ske = s == 1.0
    neg_ske = s == 0.0
    cw00 = classweights[0, 0]
    cw01 = classweights[0, 1]
    loss_bkg = jnp.sum(jnp.where(neg, cw01 * jnp.log(1.0 - p + EPS), 0.0))
    loss_mask = jnp.sum(jnp.where(pos, cw00 * jnp.log(p * gt_weight + EPS), 0.0))
    loss_ske = jnp.sum(
        jnp.where(pos_ske, cw00 * y * jnp.log(p * (ske_weight - gt_weight) + EPS), 0.0)
    ) + jnp.sum(jnp.where(neg_ske, cw01 * (1.0 - y) * jnp.log(1.0 - p + EPS), 0.0))
    return -1.0 * (loss_mask + loss_bkg + loss_ske)


if __name__ == "__main__":
    key = jax.random.PRNGKey(0)
    k1, k2, k3 = jax.random.split(key, 3)

    B, C, H, W = 2, 4, 16, 16  # NCHW, matching the torch conv-output convention
    logits = jax.random.normal(k1, (B, C, H, W), dtype=jnp.float32)
    labels = jax.random.bernoulli(k2, 0.4, (B, C, H, W)).astype(jnp.float32)
    skes = jax.random.bernoulli(k3, 0.2, (B, C, H, W)).astype(jnp.float32)
    classweights = jnp.array([[0.7, 0.3]], dtype=jnp.float32)
    ske_weight = 2.0

    loss = weighted_bce_loss2d_ske(logits, labels, skes, classweights, ske_weight)
    loss = jax.block_until_ready(loss)

    ref = jax.block_until_ready(
        _reference(logits, labels, skes, classweights, ske_weight)
    )
    assert jnp.allclose(loss, ref, rtol=1e-4, atol=1e-2), (loss, ref)

    print("KERNEL_OK")
</pallas_src>

<mosaic_0001>
module attributes {stable_mosaic.version = 11 : i64} {
  func.func @_wbce_ske_kernel(%arg0: i32, %arg1: i32, %arg2: memref<1xi32, #tpu.memory_space<smem>>, %arg3: memref<1x3xf32, #tpu.memory_space<smem>>, %arg4: memref<64x128xf32, #tpu.memory_space<vmem>>, %arg5: memref<64x128xf32, #tpu.memory_space<vmem>>, %arg6: memref<64x128xf32, #tpu.memory_space<vmem>>, %arg7: memref<8x128xf32, #tpu.memory_space<vmem>>) attributes {dimension_semantics = [#tpu.dimension_semantics<parallel>, #tpu.dimension_semantics<arbitrary>], iteration_bounds = array<i64: 1, 1>, scalar_prefetch = 0 : i64, scratch_operands = 0 : i64, tpu.core_type = #tpu.core_type<tc>, window_params = [{transform_indices = @transform_0, window_bounds = array<i64: 1>}, {transform_indices = @transform_1, window_bounds = array<i64: 1, 3>}, {transform_indices = @transform_2, window_bounds = array<i64: 64, 128>}, {transform_indices = @transform_3, window_bounds = array<i64: 64, 128>}, {transform_indices = @transform_4, window_bounds = array<i64: 64, 128>}, {transform_indices = @transform_5, window_bounds = array<i64: 8, 128>}]} {
    %c0_i32 = arith.constant 0 : i32
    %0 = arith.cmpi eq, %arg1, %c0_i32 : i32
    %1 = arith.extui %0 : i1 to i32
    %c0_i32_0 = arith.constant 0 : i32
    %2 = arith.cmpi ne, %1, %c0_i32_0 : i32
    scf.if %2 {
      %cst_34 = arith.constant 0.000000e+00 : f32
      %89 = vector.broadcast %cst_34 : f32 to vector<8x128xf32>
      %c0_35 = arith.constant 0 : index
      %c0_36 = arith.constant 0 : index
      %90 = vector.load %arg7[%c0_35, %c0_36] : memref<8x128xf32, #tpu.memory_space<vmem>>, vector<8x128xf32>
      tpu.vector_store %arg7[%c0_35, %c0_36], %89 {strides = array<i32>} : memref<8x128xf32, #tpu.memory_space<vmem>>, vector<8x128xf32>,
    } else {
    }
    %c0 = arith.constant 0 : index
    %3 = memref.load %arg2[%c0] : memref<1xi32, #tpu.memory_space<smem>>
    %c0_1 = arith.constant 0 : index
    %c0_2 = arith.constant 0 : index
    %4 = memref.load %arg3[%c0_1, %c0_2] : memref<1x3xf32, #tpu.memory_space<smem>>
    %c0_3 = arith.constant 0 : index
    %c1 = arith.constant 1 : index
    %5 = memref.load %arg3[%c0_3, %c1] : memref<1x3xf32, #tpu.memory_space<smem>>
    %c0_4 = arith.constant 0 : index
    %c2 = arith.constant 2 : index
    %6 = memref.load %arg3[%c0_4, %c2] : memref<1x3xf32, #tpu.memory_space<smem>>
    %cst = arith.constant 1.000000e+00 : f32
    %7 = arith.subf %6, %cst : f32
    %c1_i32 = arith.constant 1 : i32
    %8 = arith.muli %arg0, %c1_i32 : i32
    %9 = arith.addi %8, %arg1 : i32
    %c8192_i32 = arith.constant 8192 : i32
    %10 = arith.muli %9, %c8192_i32 : i32
    %11 = tpu.iota {dimensions = array<i32: 0>} : vector<64x128xi32>
    %c128_i32 = arith.constant 128 : i32
    %12 = vector.broadcast %c128_i32 : i32 to vector<64x128xi32>
    %13 = arith.muli %11, %12 : vector<64x128xi32>
    %14 = tpu.iota {dimensions = array<i32: 1>} : vector<64x128xi32>
    %15 = arith.addi %13, %14 : vector<64x128xi32>
    %cst_5 = arith.constant 0.000000e+00 : f32
    %16 = vector.broadcast %cst_5 : f32 to vector<8x128xf32>
    %c0_i32_6 = arith.constant 0 : i32
    %c64_i32 = arith.constant 64 : i32
    %17 = arith.muli %c0_i32_6, %c64_i32 : i32
    %18 = tpu.assume_multiple %17, 64 : i32
    %19 = arith.index_cast %18 : i32 to index
    %c0_7 = arith.constant 0 : index
    %20 = vector.load %arg4[%19, %c0_7] : memref<64x128xf32, #tpu.memory_space<vmem>>, vector<64x128xf32>
    %21 = arith.index_cast %18 : i32 to index
    %c0_8 = arith.constant 0 : index
    %22 = vector.load %arg5[%21, %c0_8] : memref<64x128xf32, #tpu.memory_space<vmem>>, vector<64x128xf32>
    %23 = arith.index_cast %18 : i32 to index
    %c0_9 = arith.constant 0 : index
    %24 = vector.load %arg6[%23, %c0_9] : memref<64x128xf32, #tpu.memory_space<vmem>>, vector<64x128xf32>
    %c128_i32_10 = arith.constant 128 : i32
    %25 = arith.muli %18, %c128_i32_10 : i32
    %26 = arith.addi %10, %25 : i32
    %27 = vector.broadcast %26 : i32 to vector<64x128xi32>
    %28 = arith.addi %15, %27 : vector<64x128xi32>
    %29 = vector.broadcast %3 : i32 to vector<64x128xi32>
    %30 = arith.cmpi slt, %28, %29 : vector<64x128xi32>
    %cst_11 = arith.constant 1.000000e+00 : f32
    %31 = vector.broadcast %cst_11 : f32 to vector<64x128xf32>
    %32 = arith.cmpf oeq, %22, %31 : vector<64x128xf32>
    %cst_12 = arith.constant 0.000000e+00 : f32
    %33 = vector.broadcast %cst_12 : f32 to vector<64x128xf32>
    %34 = arith.cmpf oeq, %22, %33 : vector<64x128xf32>
    %cst_13 = arith.constant 1.000000e+00 : f32
    %35 = vector.broadcast %cst_13 : f32 to vector<64x128xf32>
    %36 = arith.cmpf oeq, %24, %35 : vector<64x128xf32>
    %cst_14 = arith.constant 0.000000e+00 : f32
    %37 = vector.broadcast %cst_14 : f32 to vector<64x128xf32>
    %38 = arith.cmpf oeq, %24, %37 : vector<64x128xf32>
    %39 = arith.negf %20 : vector<64x128xf32>
    %40 = math.exp %39 : vector<64x128xf32>
    %cst_15 = arith.constant 1.000000e+00 : f32
    %41 = vector.broadcast %cst_15 : f32 to vector<64x128xf32>
    %42 = arith.addf %41, %40 : vector<64x128xf32>
    %43 = arith.divf %41, %42 : vector<64x128xf32>
    %cst_16 = arith.constant 1.000000e+00 : f32
    %44 = vector.broadcast %cst_16 : f32 to vector<64x128xf32>
    %45 = arith.subf %44, %43 : vector<64x128xf32>
    %cst_17 = arith.constant 9.99999974E-5 : f32
    %46 = vector.broadcast %cst_17 : f32 to vector<64x128xf32>
    %47 = arith.addf %45, %46 : vector<64x128xf32>
    %48 = math.log %47 : vector<64x128xf32>
    %cst_18 = arith.constant 1.000000e+00 : f32
    %cst_19 = arith.constant 0.000000e+00 : f32
    %49 = vector.broadcast %cst_18 : f32 to vector<64x128xf32>
    %50 = vector.broadcast %cst_19 : f32 to vector<64x128xf32>
    %51 = arith.select %34, %49, %50 : vector<64x128xi1>, vector<64x128xf32>
    %cst_20 = arith.constant 1.000000e+00 : f32
    %52 = vector.broadcast %cst_20 : f32 to vector<64x128xf32>
    %53 = arith.subf %52, %22 : vector<64x128xf32>
    %cst_21 = arith.constant 0.000000e+00 : f32
    %54 = vector.broadcast %cst_21 : f32 to vector<64x128xf32>
    %55 = arith.select %38, %53, %54 : vector<64x128xi1>, vector<64x128xf32>
    %56 = arith.addf %51, %55 : vector<64x128xf32>
    %cst_22 = arith.constant 9.99999974E-5 : f32
    %57 = vector.broadcast %cst_22 : f32 to vector<64x128xf32>
    %58 = arith.addf %43, %57 : vector<64x128xf32>
    %cst_23 = arith.constant 1.000000e+00 : f32
    %59 = vector.broadcast %cst_23 : f32 to vector<64x128xf32>
    %60 = arith.select %32, %58, %59 : vector<64x128xi1>, vector<64x128xf32>
    %61 = arith.andi %32, %36 : vector<64x128xi1>
    %62 = vector.broadcast %7 : f32 to vector<64x128xf32>
    %63 = arith.mulf %43, %62 : vector<64x128xf32>
    %cst_24 = arith.constant 9.99999974E-5 : f32
    %64 = vector.broadcast %cst_24 : f32 to vector<64x128xf32>
    %65 = arith.addf %63, %64 : vector<64x128xf32>
    %cst_25 = arith.constant 1.000000e+00 : f32
    %66 = vector.broadcast %cst_25 : f32 to vector<64x128xf32>
    %67 = arith.select %61, %65, %66 : vector<64x128xi1>, vector<64x128xf32>
    %68 = arith.mulf %60, %67 : vector<64x128xf32>
    %69 = vector.broadcast %5 : f32 to vector<64x128xf32>
    %70 = arith.mulf %69, %56 : vector<64x128xf32>
    %71 = arith.mulf %70, %48 : vector<64x128xf32>
    %72 = math.log %68 : vector<64x128xf32>
    %73 = vector.broadcast %4 : f32 to vector<64x128xf32>
    %74 = arith.mulf %73, %72 : vector<64x128xf32>
    %75 = arith.addf %71, %74 : vector<64x128xf32>
    %cst_26 = arith.constant 0.000000e+00 : f32
    %76 = vector.broadcast %cst_26 : f32 to vector<64x128xf32>
    %77 = arith.select %30, %75, %76 : vector<64x128xi1>, vector<64x128xf32>
    %78 = vector.shape_cast %77 : vector<64x128xf32> to vector<8x8x128xf32>
    %79 = vector.extract_strided_slice %78 {offsets = [0, 0, 0], sizes = [4, 8, 128], strides = [1, 1, 1]} : vector<8x8x128xf32> to vector<4x8x128xf32>
    %cst_27 = arith.constant dense<0.000000e+00> : vector<8x128xf32>
    %80 = vector.multi_reduction <add>, %79, %cst_27 [0] : vector<4x8x128xf32> to vector<8x128xf32>
    %81 = arith.addf %16, %80 : vector<8x128xf32>
    %82 = vector.extract_strided_slice %78 {offsets = [4, 0, 0], sizes = [4, 8, 128], strides = [1, 1, 1]} : vector<8x8x128xf32> to vector<4x8x128xf32>
    %cst_28 = arith.constant dense<0.000000e+00> : vector<8x128xf32>
    %83 = vector.multi_reduction <add>, %82, %cst_28 [0] : vector<4x8x128xf32> to vector<8x128xf32>
    %84 = arith.addf %16, %83 : vector<8x128xf32>
    %c1_i32_29 = arith.constant 1 : i32
    %c0_30 = arith.constant 0 : index
    %c0_31 = arith.constant 0 : index
    %85 = vector.load %arg7[%c0_30, %c0_31] : memref<8x128xf32, #tpu.memory_space<vmem>>, vector<8x128xf32>
    %86 = arith.addf %81, %84 : vector<8x128xf32>
    %87 = arith.addf %85, %86 : vector<8x128xf32>
    %c0_32 = arith.constant 0 : index
    %c0_33 = arith.constant 0 : index
    %88 = vector.load %arg7[%c0_32, %c0_33] : memref<8x128xf32, #tpu.memory_space<vmem>>, vector<8x128xf32>
    tpu.vector_store %arg7[%c0_32, %c0_33], %87 {strides = array<i32>} : memref<8x128xf32, #tpu.memory_space<vmem>>, vector<8x128xf32>,
    return
  }
  func.func @transform_0(%arg0: i32, %arg1: i32) -> i32 {
    %c0_i32 = arith.constant 0 : i32
    %c0_i32_0 = arith.constant 0 : i32
    return %c0_i32 : i32
  }
  func.func @transform_1(%arg0: i32, %arg1: i32) -> (i32, i32) {
    %c0_i32 = arith.constant 0 : i32
    %c0_i32_0 = arith.constant 0 : i32
    %c0_i32_1 = arith.constant 0 : i32
    return %c0_i32, %c0_i32_0 : i32, i32
  }
  func.func @transform_2(%arg0: i32, %arg1: i32) -> (i32, i32) {
    %c1_i32 = arith.constant 1 : i32
    %0 = arith.muli %arg0, %c1_i32 : i32
    %1 = arith.addi %0, %arg1 : i32
    %c0_i32 = arith.constant 0 : i32
    %2 = arith.minsi %1, %c0_i32 : i32
    %c0_i32_0 = arith.constant 0 : i32
    %c0_i32_1 = arith.constant 0 : i32
    return %2, %c0_i32_0 : i32, i32
  }
  func.func @transform_3(%arg0: i32, %arg1: i32) -> (i32, i32) {
    %c1_i32 = arith.constant 1 : i32
    %0 = arith.muli %arg0, %c1_i32 : i32
    %1 = arith.addi %0, %arg1 : i32
    %c0_i32 = arith.constant 0 : i32
    %2 = arith.minsi %1, %c0_i32 : i32
    %c0_i32_0 = arith.constant 0 : i32
    %c0_i32_1 = arith.constant 0 : i32
    return %2, %c0_i32_0 : i32, i32
  }
  func.func @transform_4(%arg0: i32, %arg1: i32) -> (i32, i32) {
    %c1_i32 = arith.constant 1 : i32
    %0 = arith.muli %arg0, %c1_i32 : i32
    %1 = arith.addi %0, %arg1 : i32
    %c0_i32 = arith.constant 0 : i32
    %2 = arith.minsi %1, %c0_i32 : i32
    %c0_i32_0 = arith.constant 0 : i32
    %c0_i32_1 = arith.constant 0 : i32
    return %2, %c0_i32_0 : i32, i32
  }
  func.func @transform_5(%arg0: i32, %arg1: i32) -> (i32, i32) {
    %c0_i32 = arith.constant 0 : i32
    %c0_i32_0 = arith.constant 0 : i32
    return %arg0, %c0_i32 : i32, i32
  }
}

</mosaic_0001>

<bundles_post_ra>
// kernel: tpu_custom_call.1
= control target key start
LH: loop header
LB: loop body
LE: loop exit
PB: predicated region body
PF: predicated region fallthrough
CT: control target
= control target key end

     0   :  { %11 = vsyncpa [#allocation6], 0  ;;  %s1085_s0 = inlined_call_operand.<no memory space> [shape: s32[1], index: 0, kind: input, shape index: {}]   ;;  %s1086_s1 = inlined_call_operand.vmem [shape: f32[1,3], index: 1, kind: input, shape index: {}]   ;;  %s1087_s2 = inlined_call_operand.hbm [shape: f32[16,128], index: 2, kind: input, shape index: {}]   ;;  %s1088_s3 = inlined_call_operand.hbm [shape: f32[16,128], index: 3, kind: input, shape index: {}]   ;;  %s1089_s4 = inlined_call_operand.hbm [shape: f32[16,128], index: 4, kind: input, shape index: {}]   ;;  %s1090_s5 = inlined_call_operand.hbm [shape: f32[8,128], index: 5, kind: output, shape index: {}]  }
   0x1   :  { %12 = vsyncpa [#allocation4], 0 }
   0x2   :  { %13 = vsyncpa [#allocation9], 0 }
   0x3   :  { %14 = vsyncpa [#allocation5], 0  ;;  %s23_s20 = sshll.u32 %s1086_s1, 4  ;;  %s24_s20 = int_to_ptr.vmem [resolvable:$true] %s23_s20 }
   0x4   :  { %s584_s21 = scalar_lea.vmem %s24_s20, 16  ;;  %p589_p1 = scmp.lt.s32.totalorder %s24_s20, %s24_s20 }
   0x5   :  { %p585_p0 = scmp.ne.s32.totalorder %s24_s20, %s584_s21  ;;  %p590_p2 = scmp.lt.s32.totalorder %s584_s21, %s584_s21 }
   0x7   :  { %p591_p3 = por %p590_p2, %p589_p1 }
   0x9   :  { %p592_p4 = pnand %p591_p3, %p585_p0 }
   0xb   :  { %595 = shalt.err (!%p592_p4)
}
   0xc   :  { %s684_s22 = smov [#allocation3]  }
   0xd   :  { %26 = dma.vmem_to_smem %s24_s20, 16, %s684_s22, [#allocation6]  }
   0xe   :  { %37 = vsyncadd [#allocation4], 768  ;;  %s685_s23 = smov [#allocation7]  }
   0xf   :  { %s42_s24 = sshll.u32 %s685_s23, 4  ;;  %s43_s24 = int_to_ptr.vmem [resolvable:$true] %s42_s24 }
  0x10   :  { %s604_s25 = scalar_lea.vmem %s43_s24, 256  ;;  %s608_s26 = scalar_lea.vmem %s43_s24, 1024 }
  0x11   :  { %p605_p5 = scmp.ne.s32.totalorder %s43_s24, %s604_s25  ;;  %p609_p6 = scmp.lt.s32.totalorder %s43_s24, %s43_s24 }
  0x12   :  { %p610_p7 = scmp.lt.s32.totalorder %s608_s26, %s604_s25 }
  0x14   :  { %p611_p8 = por %p610_p7, %p609_p6 }
  0x16   :  { %p612_p9 = pnand %p611_p8, %p605_p5 }
  0x18   :  { %615 = shalt.err (!%p612_p9)
}
  0x19   :  { %s686_s1 = smov 128   ;;  %s687_s27 = smov 8  }
  0x1a   :  { %48 = dma.hbm_to_vmem [thread:$0]  %s1087_s2, 256, %s43_s24, [#allocation4], %s686_s1, %s686_s1, %s687_s27  }
  0x1b   :  { %59 = vsyncadd [#allocation9], 768  ;;  %s688_s30 = smov [#allocation8]  }
  0x1c   :  { %s64_s6 = sshll.u32 %s688_s30, 4  ;;  %s65_s6 = int_to_ptr.vmem [resolvable:$true] %s64_s6 }
  0x1d   :  { %s624_s7 = scalar_lea.vmem %s65_s6, 256  ;;  %s628_s8 = scalar_lea.vmem %s65_s6, 1024 }
  0x1e   :  { %p625_p10 = scmp.ne.s32.totalorder %s65_s6, %s624_s7  ;;  %p629_p11 = scmp.lt.s32.totalorder %s65_s6, %s65_s6 }
  0x1f   :  { %p630_p12 = scmp.lt.s32.totalorder %s628_s8, %s624_s7 }
  0x21   :  { %p631_p13 = por %p630_p12, %p629_p11 }
  0x23   :  { %p632_p0 = pnand %p631_p13, %p625_p10 }
  0x25   :  { %635 = shalt.err (!%p632_p0)
}
  0x26   :  { %70 = dma.hbm_to_vmem [thread:$0]  %s1088_s3, 256, %s65_s6, [#allocation9], %s686_s1, %s686_s1, %s687_s27  }
  0x27   :  { %81 = vsyncadd [#allocation9], 768  ;;  %s689_s2 = smov [#allocation10]  }
  0x28   :  { %s86_s11 = sshll.u32 %s689_s2, 4  ;;  %s87_s11 = int_to_ptr.vmem [resolvable:$true] %s86_s11 }
  0x29   :  { %s644_s12 = scalar_lea.vmem %s87_s11, 256  ;;  %s648_s13 = scalar_lea.vmem %s87_s11, 1024 }
  0x2a   :  { %p645_p1 = scmp.ne.s32.totalorder %s87_s11, %s644_s12  ;;  %p649_p2 = scmp.lt.s32.totalorder %s87_s11, %s87_s11 }
  0x2b   :  { %p650_p3 = scmp.lt.s32.totalorder %s648_s13, %s644_s12 }
  0x2d   :  { %p651_p4 = por %p650_p3, %p649_p2 }
  0x2f   :  { %p652_p5 = pnand %p651_p4, %p645_p1 }
  0x31   :  { %655 = shalt.err (!%p652_p5)
}
  0x32   :  { %92 = dma.hbm_to_vmem [thread:$0]  %s1089_s4, 256, %s87_s11, [#allocation9], %s686_s1, %s686_s1, %s687_s27  }
  0x33   :  { %676 = dma.done.wait [#allocation6], 16  }
  0x34   :  { %677 = vsyncadd [#allocation6], 4294967280 }
  0x35   :  { %678 = dma.done.wait [#allocation4], 1024  }
  0x36   :  { %679 = vsyncadd [#allocation4], 4294966272 }
  0x37   :  { %680 = dma.done.wait [#allocation9], 2048  }
  0x38   :  { %681 = vsyncadd [#allocation9], 4294965248 }
  0x39   :  { %105 = sfence }
  0x3a   :  { %v163_v0 = vld [vmem:[#allocation7] sm:$0xff]  ;;  %v164_v2 = vld [vmem:[#allocation7 + $0x8] sm:$0xff]  ;;  %v165_v3 = vld [vmem:[#allocation7 + $0x10] sm:$0xff]  ;;  %s743_s3 = sld [smem:[#allocation3 + $0x2]]  ;;  %v136_v18 = vlaneseq  ;;  %v773_v57 = vstv %s1085_s0  ;;  %s691_s19 = smov [#allocation11]  }
  0x3b   :  { %v504_v1 = vmul.f32 -1.442695, %v163_v0  ;;  %v166_v4 = vld [vmem:[#allocation7 + $0x18] sm:$0xff]  ;;  %v167_v5 = vld [vmem:[#allocation7 + $0x20] sm:$0xff]  ;;  %v168_v6 = vld [vmem:[#allocation7 + $0x28] sm:$0xff]  ;;  %s760_s16 = sld [smem:[#allocation3 + $0x1]] }
  0x3c   :  { %v169_v7 = vld [vmem:[#allocation7 + $0x30] sm:$0xff]  ;;  %v505_v8 = vmul.f32 -1.442695, %v164_v2  ;;  %v506_v9 = vmul.f32 -1.442695, %v165_v3  ;;  %v170_v11 = vld [vmem:[#allocation7 + $0x38] sm:$0xff] }
  0x3d   :  { %520 = vpow2.f32 %v504_v1  ;;  %v507_v10 = vmul.f32 -1.442695, %v166_v4  ;;  %v508_v12 = vmul.f32 -1.442695, %v167_v5  ;;  %v509_v14 = vmul.f32 -1.442695, %v168_v6 }
  0x3e   :  { %522 = vpow2.f32 %v505_v8  ;;  %v510_v15 = vmul.f32 -1.442695, %v169_v7  ;;  %v511_v16 = vmul.f32 -1.442695, %v170_v11  ;;  %v137_v19 = vshrl.u32 %v136_v18, 7  ;;  %v750_v33 = vld [vmem:[#allocation8] sm:$0xff] }
  0x3f   :  { %524 = vpow2.f32 %v506_v9  ;;  %v746_v23 = vand.u32 127, %v136_v18  ;;  %v754_v38 = vld [vmem:[#allocation10] sm:$0xff]  ;;  %vm207_vm0 = vcmp.eq.f32.partialorder %v750_v33, 1.0  ;;  %v766_v55 = vld [vmem:[#allocation8 + $0x8] sm:$0xff]  ;;  %v768_v56 = vld [vmem:[#allocation8 + $0x10] sm:$0xff]  ;;  %vm215_vm5 = vcmp.eq.f32.partialorder %v750_v33, 0.0 }
  0x40   :  { %526 = vpow2.f32 %v507_v10  ;;  %s503_s4 = sadd.f32 -1.0, %s743_s3  ;;  %v138_v22 = vadd.s32 8, %v137_v19  ;;  %v139_v26 = vadd.s32 16, %v137_v19  ;;  %v140_v27 = vadd.s32 24, %v137_v19  ;;  %v788_v63 = vld [vmem:[#allocation8 + $0x18] sm:$0xff]  ;;  %v790_v0 = vld [vmem:[#allocation10 + $0x8] sm:$0xff] }
  0x41   :  { %528 = vpow2.f32 %v508_v12  ;;  %v141_v28 = vadd.s32 32, %v137_v19  ;;  %v142_v31 = vadd.s32 40, %v137_v19  ;;  %v748_v32 = vadd.s32 48, %v137_v19  ;;  %v802_v6 = vld [vmem:[#allocation8 + $0x20] sm:$0xff]  ;;  %v804_v7 = vld [vmem:[#allocation10 + $0x10] sm:$0xff]  ;;  %v806_v8 = vld [vmem:[#allocation10 + $0x18] sm:$0xff] }
  0x42   :  { %530 = vpow2.f32 %v509_v14  ;;  %v752_v36 = vadd.s32 56, %v137_v19  ;;  %v145_v37 = vmul.u32 128, %v137_v19  ;;  %v146_v41 = vmul.u32 128, %v138_v22  ;;  %v808_v9 = vld [vmem:[#allocation8 + $0x28] sm:$0xff]  ;;  %v810_v10 = vld [vmem:[#allocation10 + $0x20] sm:$0xff]  ;;  %v835_v19 = vld [vmem:[#allocation8 + $0x38] sm:$0xff] }
  0x43   :  { %532 = vpow2.f32 %v510_v15  ;;  %v756_v43 = vstv %s503_s4  ;;  %v147_v45 = vmul.u32 128, %v139_v26  ;;  %v148_v48 = vmul.u32 128, %v140_v27  ;;  %v822_v14 = vld [vmem:[#allocation10 + $0x28] sm:$0xff]  ;;  %s964_s0 = sld [smem:[#allocation3]]  ;;  %s484_s20 = sshll.u32 %s691_s19, 4  ;;  %s485_s20 = int_to_ptr.vmem [resolvable:$true] %s484_s20 }
  0x44   :  { %534 = vpow2.f32 %v511_v16  ;;  %vm223_vm1 = vcmp.eq.f32.partialorder %v754_v38, 1.0  ;;  %v149_v50 = vmul.u32 128, %v141_v28  ;;  %v150_v51 = vmul.u32 128, %v142_v31  ;;  %v828_v16 = vld [vmem:[#allocation10 + $0x30] sm:$0xff]  ;;  %s656_s21 = scalar_lea.vmem %s485_s20, 128  ;;  %p661_p7 = scmp.lt.s32.totalorder %s485_s20, %s485_s20 }
  0x45   :  { %v764_v54 = vadd.s32 %v746_v23, %v145_v37  ;;  %vm777_vm2 = vmand %vm207_vm0, %vm223_vm1  ;;  %v783_v61 = vadd.s32 %v746_v23, %v146_v41  ;;  %v786_v62 = vadd.s32 %v746_v23, %v147_v45  ;;  %v794_v3 = vadd.s32 %v746_v23, %v148_v48  ;;  %p657_p6 = scmp.ne.s32.totalorder %s485_s20, %s656_s21  ;;  %p662_p8 = scmp.lt.s32.totalorder %s656_s21, %s656_s21 }
  0x46   :  { %v797_v4 = vadd.s32 %v746_v23, %v149_v50  ;;  %v800_v5 = vadd.s32 %v746_v23, %v150_v51  ;;  %vm208_vm3 = vcmp.eq.f32.partialorder %v766_v55, 1.0  ;;  %vm209_vm4 = vcmp.eq.f32.partialorder %v768_v56, 1.0 }
  0x47   :  { %vm216_vm6 = vcmp.eq.f32.partialorder %v766_v55, 0.0  ;;  %vm217_vm7 = vcmp.eq.f32.partialorder %v768_v56, 0.0  ;;  %vm218_vm8 = vcmp.eq.f32.partialorder %v788_v63, 0.0  ;;  %vm224_vm9 = vcmp.eq.f32.partialorder %v790_v0, 1.0  ;;  %p663_p9 = por %p662_p8, %p661_p7 }
  0x48   :  { %v327_v15 = vsub.f32 1.0, %v750_v33  ;;  %vm210_vm10 = vcmp.eq.f32.partialorder %v788_v63, 1.0  ;;  %vm211_vm11 = vcmp.eq.f32.partialorder %v802_v6, 1.0  ;;  %vm225_vm12 = vcmp.eq.f32.partialorder %v804_v7, 1.0 }
  0x49   :  { %vm226_vm13 = vcmp.eq.f32.partialorder %v806_v8, 1.0  ;;  %vm231_vm14 = vcmp.eq.f32.partialorder %v754_v38, 0.0  ;;  %vm212_vm15 = vcmp.eq.f32.partialorder %v808_v9, 1.0  ;;  %vm228_vm1 = vcmp.eq.f32.partialorder %v822_v14, 1.0  ;;  %p664_p10 = pnand %p663_p9, %p657_p6 }
  0x4a   :  { %v521_v13 = vpop.eup %520  ;;  %v871_v37 = vsel %vm231_vm14, %v327_v15, 0.0  ;;  %vm886_vm14 = vmand %vm208_vm3, %vm224_vm9 }
  0x4b   :  { %v263_v17 = vadd.f32 1.0, %v521_v13  ;;  %v523_v20 = vpop.eup %522  ;;  %v820_v13 = vld [vmem:[#allocation8 + $0x30] sm:$0xff] }
  0x4c   :  { %v525_v21 = vpop.eup %524  ;;  %v264_v24 = vadd.f32 1.0, %v523_v20  ;;  %v837_v20 = vld [vmem:[#allocation10 + $0x38] sm:$0xff] }
  0x4d   :  { %536 = vrcp.f32 %v263_v17  ;;  %v527_v25 = vpop.eup %526  ;;  %v265_v29 = vadd.f32 1.0, %v525_v21  ;;  %v690_v21 = vmov 0.0  }
  0x4e   :  { %v529_v30 = vpop.eup %528  ;;  %v266_v34 = vadd.f32 1.0, %v527_v25  ;;  %538 = vrcp.f32 %v264_v24  ;;  %v844_v22 = vsel %vm215_vm5, 1.0, %v690_v21  ;;  %v847_v25 = vstv %s760_s16 }
  0x4f   :  { %v531_v35 = vpop.eup %530  ;;  %v267_v39 = vadd.f32 1.0, %v529_v30  ;;  %540 = vrcp.f32 %v265_v29  ;;  %v853_v28 = vsel %vm216_vm6, 1.0, %v690_v21  ;;  %v858_v29 = vsel %vm217_vm7, 1.0, %v690_v21 }
  0x50   :  { %v533_v40 = vpop.eup %532  ;;  %v268_v42 = vadd.f32 1.0, %v531_v35  ;;  %542 = vrcp.f32 %v266_v34  ;;  %v863_v30 = vsel %vm218_vm8, 1.0, %v690_v21  ;;  %vm229_vm5 = vcmp.eq.f32.partialorder %v828_v16, 1.0  ;;  %vm894_vm8 = vmand %vm209_vm4, %vm225_vm12 }
  0x51   :  { %v535_v44 = vpop.eup %534  ;;  %v269_v46 = vadd.f32 1.0, %v533_v40  ;;  %544 = vrcp.f32 %v267_v39  ;;  %v328_v34 = vsub.f32 1.0, %v766_v55  ;;  %v329_v35 = vsub.f32 1.0, %v768_v56  ;;  %vm932_vm12 = vmand %vm212_vm15, %vm228_vm1 }
  0x52   :  { %v270_v49 = vadd.f32 1.0, %v535_v44  ;;  %546 = vrcp.f32 %v268_v42  ;;  %vm232_vm6 = vcmp.eq.f32.partialorder %v790_v0, 0.0  ;;  %vm233_vm7 = vcmp.eq.f32.partialorder %v804_v7, 0.0 }
  0x53   :  { %548 = vrcp.f32 %v269_v46  ;;  %vm222_vm1 = vcmp.eq.f32.partialorder %v835_v19, 0.0  ;;  %v1006_v0 = vstv %s964_s0 }
  0x54   :  { %550 = vrcp.f32 %v270_v49 }
  0x5a   :  { %v537_v47 = vpop.eup %536 }
  0x5b   :  { %v376_v52 = vmul.f32 %v537_v47, %v756_v43  ;;  %v351_v53 = vadd.f32 0.0001, %v537_v47  ;;  %v287_v1 = vsub.f32 1.0, %v537_v47  ;;  %v539_v18 = vpop.eup %538 }
  0x5c   :  { %v541_v26 = vpop.eup %540  ;;  %v288_v27 = vsub.f32 1.0, %v539_v18  ;;  %v352_v42 = vadd.f32 0.0001, %v539_v18  ;;  %v377_v51 = vmul.f32 %v539_v18, %v756_v43 }
  0x5d   :  { %v384_v59 = vadd.f32 0.0001, %v376_v52  ;;  %v359_v11 = vsel %vm207_vm0, %v351_v53, 1.0  ;;  %v295_v17 = vadd.f32 0.0001, %v287_v1  ;;  %vm227_vm0 = vcmp.eq.f32.partialorder %v810_v10, 1.0  ;;  %v543_v31 = vpop.eup %542 }
  0x5e   :  { %v289_v33 = vsub.f32 1.0, %v541_v26  ;;  %v545_v39 = vpop.eup %544  ;;  %v290_v40 = vsub.f32 1.0, %v543_v31  ;;  %v296_v41 = vadd.f32 0.0001, %v288_v27  ;;  %v353_v47 = vadd.f32 0.0001, %v541_v26 }
  0x5f   :  { %v392_v12 = vsel %vm777_vm2, %v384_v59, 1.0  ;;  %vm213_vm2 = vcmp.eq.f32.partialorder %v820_v13, 1.0  ;;  %552 = vlog2.f32 %v295_v17  ;;  %v547_v44 = vpop.eup %546  ;;  %v291_v45 = vsub.f32 1.0, %v545_v39 }
  0x60   :  { %v400_v24 = vmul.f32 %v392_v12, %v359_v11  ;;  %v297_v46 = vadd.f32 0.0001, %v289_v33  ;;  %v549_v48 = vpop.eup %548  ;;  %v292_v49 = vsub.f32 1.0, %v547_v44  ;;  %v298_v50 = vadd.f32 0.0001, %v290_v40 }
  0x61   :  { %v354_v38 = vadd.f32 0.0001, %v543_v31  ;;  %v551_v52 = vpop.eup %550  ;;  %v293_v53 = vsub.f32 1.0, %v549_v48  ;;  %v299_v58 = vadd.f32 0.0001, %v291_v45  ;;  %v378_v12 = vmul.f32 %v541_v26, %v756_v43 }
  0x62   :  { %554 = vlog2.f32 %v400_v24  ;;  %v355_v59 = vadd.f32 0.0001, %v545_v39  ;;  %v294_v1 = vsub.f32 1.0, %v551_v52  ;;  %v356_v11 = vadd.f32 0.0001, %v547_v44 }
  0x63   :  { %556 = vlog2.f32 %v296_v41  ;;  %v357_v15 = vadd.f32 0.0001, %v549_v48  ;;  %v360_v17 = vsel %vm208_vm3, %v352_v42, 1.0  ;;  %v361_v18 = vsel %vm209_vm4, %v353_v47, 1.0  ;;  %vm908_vm3 = vmand %vm210_vm10, %vm226_vm13 }
  0x64   :  { %558 = vlog2.f32 %v297_v46  ;;  %v300_v27 = vadd.f32 0.0001, %v292_v49  ;;  %v301_v33 = vadd.f32 0.0001, %v293_v53  ;;  %v358_v26 = vadd.f32 0.0001, %v551_v52  ;;  %vm919_vm4 = vmand %vm211_vm11, %vm227_vm0 }
  0x65   :  { %560 = vlog2.f32 %v298_v50  ;;  %v302_v41 = vadd.f32 0.0001, %v294_v1  ;;  %v362_v42 = vsel %vm210_vm10, %v354_v38, 1.0  ;;  %v363_v45 = vsel %vm211_vm11, %v355_v59, 1.0  ;;  %vm943_vm0 = vmand %vm213_vm2, %vm229_vm5 }
  0x66   :  { %562 = vlog2.f32 %v299_v58  ;;  %v379_v47 = vmul.f32 %v543_v31, %v756_v43  ;;  %v364_v49 = vsel %vm212_vm15, %v356_v11, 1.0  ;;  %v380_v38 = vmul.f32 %v545_v39, %v756_v43 }
  0x67   :  { %v381_v53 = vmul.f32 %v547_v44, %v756_v43  ;;  %v382_v58 = vmul.f32 %v549_v48, %v756_v43  ;;  %v383_v59 = vmul.f32 %v551_v52, %v756_v43  ;;  %v385_v1 = vadd.f32 0.0001, %v377_v51 }
  0x68   :  { %v386_v39 = vadd.f32 0.0001, %v378_v12  ;;  %v387_v11 = vadd.f32 0.0001, %v379_v47  ;;  %564 = vlog2.f32 %v300_v27  ;;  %v388_v48 = vadd.f32 0.0001, %v380_v38 }
  0x69   :  { %v389_v2 = vadd.f32 0.0001, %v381_v53  ;;  %v390_v60 = vadd.f32 0.0001, %v382_v58  ;;  %vm221_vm15 = vcmp.eq.f32.partialorder %v820_v13, 0.0  ;;  %vm237_vm11 = vcmp.eq.f32.partialorder %v828_v16, 0.0 }
  0x6a   :  { %vm1105_vm13 = vcmp.eq.f32.partialorder %v837_v20, 1.0  ;;  %vm1106_vm10 = vcmp.eq.f32.partialorder %v835_v19, 1.0  ;;  %v391_v51 = vadd.f32 0.0001, %v383_v59  ;;  %v393_v52 = vsel %vm886_vm14, %v385_v1, 1.0 }
  0x6b   :  { %vm954_vm9 = vmand %vm1106_vm10, %vm1105_vm13  ;;  %v394_v12 = vsel %vm894_vm8, %v386_v39, 1.0  ;;  %v395_v27 = vsel %vm908_vm3, %v387_v11, 1.0  ;;  %vm238_vm5 = vcmp.eq.f32.partialorder %v837_v20, 0.0  ;;  %v365_v47 = vsel %vm213_vm2, %v357_v15, 1.0 }
  0x6c   :  { %v396_v38 = vsel %vm919_vm4, %v388_v48, 1.0  ;;  %v397_v24 = vsel %vm932_vm12, %v389_v2, 1.0  ;;  %v401_v53 = vmul.f32 %v393_v52, %v360_v17  ;;  %v553_v58 = vpop.eup %552  ;;  %566 = vlog2.f32 %v301_v33  ;;  %vm1109_vm8 = vmmov %vm1106_vm10 }
  0x6d   :  { %v398_v40 = vsel %vm943_vm0, %v390_v60, 1.0  ;;  %v402_v46 = vmul.f32 %v394_v12, %v361_v18  ;;  %v403_v59 = vmul.f32 %v395_v27, %v362_v42  ;;  %568 = vlog2.f32 %v302_v41 }
  0x6e   :  { %v366_v39 = vsel %vm1109_vm8, %v358_v26, 1.0  ;;  %v399_v15 = vsel %vm954_vm9, %v391_v51, 1.0  ;;  %v404_v50 = vmul.f32 %v396_v38, %v363_v45  ;;  %vm1110_vm2 = vcmp.eq.f32.partialorder %v802_v6, 0.0 }
  0x6f   :  { %v555_v1 = vpop.eup %554  ;;  %v323_v2 = vsel %vm1110_vm2, 1.0, %v690_v21  ;;  %v343_v17 = vadd.f32 %v871_v37, %v844_v22  ;;  %v405_v33 = vmul.f32 %v397_v24, %v364_v49  ;;  %570 = vlog2.f32 %v401_v53 }
  0x70   :  { %v557_v60 = vpop.eup %556  ;;  %v330_v18 = vsub.f32 1.0, %v788_v63  ;;  %v331_v41 = vsub.f32 1.0, %v802_v6  ;;  %v406_v42 = vmul.f32 %v398_v40, %v365_v47  ;;  %572 = vlog2.f32 %v402_v46 }
  0x71   :  { %v559_v26 = vpop.eup %558  ;;  %v332_v31 = vsub.f32 1.0, %v808_v9  ;;  %v333_v45 = vsub.f32 1.0, %v820_v13  ;;  %v407_v11 = vmul.f32 %v399_v15, %v366_v39  ;;  %574 = vlog2.f32 %v403_v59 }
  0x72   :  { %v561_v44 = vpop.eup %560  ;;  %v334_v22 = vsub.f32 1.0, %v835_v19  ;;  %v336_v63 = vsel %vm232_vm6, %v328_v34, 0.0  ;;  %v337_v6 = vsel %vm233_vm7, %v329_v35, 0.0  ;;  %576 = vlog2.f32 %v404_v50 }
  0x73   :  { %v563_v37 = vpop.eup %562  ;;  %v304_v49 = vmul.f32 0.6931472, %v553_v58  ;;  %v409_v48 = vmul.f32 %v847_v25, %v343_v17  ;;  %v426_v43 = vmul.f32 0.6931472, %v555_v1  ;;  %578 = vlog2.f32 %v405_v33 }
  0x74   :  { %vm199_vm14 = vcmp.lt.s32.totalorder %v764_v54, %v773_v57  ;;  %vm1111_vm3 = vcmp.eq.f32.partialorder %v808_v9, 0.0  ;;  %vm1112_vm6 = vcmp.eq.f32.partialorder %v806_v8, 0.0  ;;  %580 = vlog2.f32 %v406_v42 }
  0x75   :  { %v324_v55 = vsel %vm1111_vm3, 1.0, %v690_v21  ;;  %v338_v56 = vsel %vm1112_vm6, %v330_v18, 0.0  ;;  %vm1113_vm7 = vcmp.eq.f32.partialorder %v810_v10, 0.0  ;;  %vm1114_vm4 = vcmp.eq.f32.partialorder %v822_v14, 0.0  ;;  %v565_v52 = vpop.eup %564 }
  0x76   :  { %v339_v7 = vsel %vm1113_vm7, %v331_v41, 0.0  ;;  %v340_v34 = vsel %vm1114_vm4, %v332_v31, 0.0  ;;  %v344_v35 = vadd.f32 %v336_v63, %v853_v28  ;;  %582 = vlog2.f32 %v407_v11 }
  0x77   :  { %v325_v9 = vsel %vm221_vm15, 1.0, %v690_v21  ;;  %v326_v8 = vsel %vm222_vm1, 1.0, %v690_v21  ;;  %v341_v51 = vsel %vm237_vm11, %v333_v45, 0.0  ;;  %v345_v10 = vadd.f32 %v337_v6, %v858_v29 }
  0x78   :  { %v342_v14 = vsel %vm238_vm5, %v334_v22, 0.0  ;;  %v346_v28 = vadd.f32 %v338_v56, %v863_v30  ;;  %v417_v12 = vmul.f32 %v409_v48, %v304_v49  ;;  %v442_v27 = vmul.f32 %v1006_v0, %v426_v43 }
  0x79   :  { %v1115_v13 = vmul.u32 128, %v748_v32  ;;  %vm200_vm9 = vcmp.lt.s32.totalorder %v783_v61, %v773_v57  ;;  %v347_v16 = vadd.f32 %v339_v7, %v323_v2  ;;  %v348_v19 = vadd.f32 %v340_v34, %v324_v55  ;;  %v567_v30 = vpop.eup %566 }
  0x7a   :  { %vm201_vm10 = vcmp.lt.s32.totalorder %v786_v62, %v773_v57  ;;  %v306_v20 = vmul.f32 0.6931472, %v557_v60  ;;  %v349_v21 = vadd.f32 %v341_v51, %v325_v9  ;;  %v410_v29 = vmul.f32 %v847_v25, %v344_v35  ;;  %v569_v40 = vpop.eup %568 }
  0x7b   :  { %v1029_v47 = vadd.s32 %v746_v23, %v1115_v13  ;;  %v1116_v38 = vmul.u32 128, %v752_v36  ;;  %v308_v24 = vmul.f32 0.6931472, %v559_v26  ;;  %v350_v53 = vadd.f32 %v342_v14, %v326_v8 }
  0x7c   :  { %v411_v58 = vmul.f32 %v847_v25, %v345_v10  ;;  %vm203_vm12 = vcmp.lt.s32.totalorder %v797_v4, %v773_v57  ;;  %v310_v46 = vmul.f32 0.6931472, %v561_v44  ;;  %v412_v59 = vmul.f32 %v847_v25, %v346_v28  ;;  %v571_v39 = vpop.eup %570 }
  0x7d   :  { %v1039_v32 = vadd.s32 %v746_v23, %v1116_v38  ;;  %v450_v1 = vadd.f32 %v442_v27, %v417_v12  ;;  %vm202_vm11 = vcmp.lt.s32.totalorder %v794_v3, %v773_v57  ;;  %vm204_vm13 = vcmp.lt.s32.totalorder %v800_v5, %v773_v57  ;;  %v573_v2 = vpop.eup %572 }
  0x7e   :  { %v312_v23 = vmul.f32 0.6931472, %v563_v37  ;;  %v314_v36 = vmul.f32 0.6931472, %v565_v52  ;;  %v413_v15 = vmul.f32 %v847_v25, %v347_v16  ;;  %v414_v50 = vmul.f32 %v847_v25, %v348_v19  ;;  %v575_v41 = vpop.eup %574 }
  0x7f   :  { %v316_v17 = vmul.f32 0.6931472, %v567_v30  ;;  %v415_v33 = vmul.f32 %v847_v25, %v349_v21  ;;  %v418_v60 = vmul.f32 %v410_v29, %v306_v20  ;;  %v428_v18 = vmul.f32 0.6931472, %v571_v39  ;;  %v577_v11 = vpop.eup %576 }
  0x80   :  { %v318_v42 = vmul.f32 0.6931472, %v569_v40  ;;  %v416_v26 = vmul.f32 %v847_v25, %v350_v53  ;;  %v419_v31 = vmul.f32 %v411_v58, %v308_v24  ;;  %v430_v45 = vmul.f32 0.6931472, %v573_v2  ;;  %v579_v37 = vpop.eup %578 }
  0x81   :  { %v420_v44 = vmul.f32 %v412_v59, %v310_v46  ;;  %v432_v22 = vmul.f32 0.6931472, %v575_v41  ;;  %v443_v63 = vmul.f32 %v1006_v0, %v428_v18  ;;  %v458_v6 = vsel %vm199_vm14, %v450_v1, 0.0  ;;  %v581_v56 = vpop.eup %580 }
  0x82   :  { %v421_v49 = vmul.f32 %v413_v15, %v312_v23  ;;  %v422_v48 = vmul.f32 %v414_v50, %v314_v36  ;;  %v434_v43 = vmul.f32 0.6931472, %v577_v11  ;;  %v444_v55 = vmul.f32 %v1006_v0, %v430_v45 }
  0x83   :  { %v423_v7 = vmul.f32 %v415_v33, %v316_v17  ;;  %v436_v25 = vmul.f32 0.6931472, %v579_v37  ;;  %v445_v34 = vmul.f32 %v1006_v0, %v432_v22  ;;  %v451_v35 = vadd.f32 %v443_v63, %v418_v60  ;;  %v583_v9 = vpop.eup %582 }
  0x84   :  { %v424_v8 = vmul.f32 %v416_v26, %v318_v42  ;;  %v438_v51 = vmul.f32 0.6931472, %v581_v56  ;;  %v446_v10 = vmul.f32 %v1006_v0, %v434_v43  ;;  %v452_v52 = vadd.f32 %v444_v55, %v419_v31 }
  0x85   :  { %v440_v54 = vmul.f32 0.6931472, %v583_v9  ;;  %v447_v14 = vmul.f32 %v1006_v0, %v436_v25  ;;  %v453_v28 = vadd.f32 %v445_v34, %v420_v44  ;;  %v459_v12 = vsel %vm200_vm9, %v451_v35, 0.0 }
  0x86   :  { %v448_v27 = vmul.f32 %v1006_v0, %v438_v51  ;;  %v454_v13 = vadd.f32 %v446_v10, %v421_v49  ;;  %v460_v16 = vsel %vm201_vm10, %v452_v52, 0.0  ;;  %v466_v19 = vadd.f32 %v459_v12, %v458_v6 }
  0x87   :  { %vm205_vm0 = vcmp.lt.s32.totalorder %v1029_v47, %v773_v57  ;;  %v449_v20 = vmul.f32 %v1006_v0, %v440_v54  ;;  %v455_v21 = vadd.f32 %v447_v14, %v422_v48  ;;  %vm206_vm15 = vcmp.lt.s32.totalorder %v1039_v32, %v773_v57 }
  0x88   :  { %v456_v29 = vadd.f32 %v448_v27, %v423_v7  ;;  %v462_v61 = vsel %vm203_vm12, %v454_v13, 0.0  ;;  %v467_v30 = vadd.f32 %v466_v19, %v460_v16  ;;  %v461_v62 = vsel %vm202_vm11, %v453_v28, 0.0 }
  0x89   :  { %v457_v38 = vadd.f32 %v449_v20, %v424_v8  ;;  %v463_v47 = vsel %vm204_vm13, %v455_v21, 0.0 }
  0x8a   :  { %v464_v0 = vsel %vm205_vm0, %v456_v29, 0.0  ;;  %v470_v24 = vadd.f32 %v463_v47, %v462_v61  ;;  %v468_v58 = vadd.f32 %v467_v30, %v461_v62 }
  0x8b   :  { %v465_v53 = vsel %vm206_vm15, %v457_v38, 0.0 }
  0x8c   :  { %v471_v32 = vadd.f32 %v470_v24, %v464_v0 }
  0x8e   :  { %v472_v40 = vadd.f32 %v471_v32, %v465_v53 }
  0x90   :  { %v475_v4 = vadd.f32 %v472_v40, %v468_v58 }
  0x92   :  { %477 = vst [vmem:[#allocation11] sm:$0xff] %v475_v4 }
  0x93   :  { %667 = shalt.err (!%p664_p10)
}
  0x94   :  { %487 = dma.vmem_to_hbm [thread:$0]  %s485_s20, 128, %s1090_s5, [#allocation5]  }
  0x95   :  { %682 = dma.done.wait [#allocation5], 128  }
  0x96   :  { %683 = vsyncadd [#allocation5], 4294967168 }
  0x97   :  { %491 = vsyncpa [#allocation4], 1 }
  0x98   :  { %492 = vsyncpa [#allocation9], 1 }
  0x99   :  { %493 = vsyncpa [#allocation5], 1 }
  0x9a   :  { %494 = vsyncpa [#allocation6], 1 }

</bundles_post_ra>
